<compile_context>
chip_gen: v7x
topology: tpu7x:2x2x1
jax: 0.10.0
libtpu: 0.0.40
codegen_flags: <defaults>
</compile_context>

<pallas_src>
import jax
import jax.numpy as jnp
from jax import lax
from jax.experimental import pallas as pl
from jax.experimental.pallas import tpu as pltpu

_LANE = 128
_SUB = 8                      # f32 sublane count; partial accumulator is (8, 128)
_CHUNK = 256                  # rows per inner accumulation chunk (multiple of 32)
_TARGET_BLOCK_BYTES = 2 * 1024 * 1024   # ~2 MiB per input block per step


def _cdiv(a, b):
    return -(-a // b)


def _round_up(a, b):
    return _cdiv(a, b) * b


def _packed_sublanes(dtype):
    """Sublane packing granularity for a dtype (8 for 32-bit, 16 for bf16, 32 for int8)."""
    return max(_SUB, 32 // jnp.dtype(dtype).itemsize)


def _num_tensorcores():
    """Best-effort TensorCore count per chip (2 on v7x / megacore parts, else 1)."""
    try:
        info = pltpu.get_tpu_info()
    except Exception:
        return 1
    for name in ("num_cores", "core_count", "num_tensorcores", "tensorcore_count",
                 "cores_per_chip", "num_cores_per_chip"):
        v = getattr(info, name, None)
        if v is None:
            continue
        try:
            v = int(v)
        except (TypeError, ValueError):
            continue
        if 1 <= v <= 16:
            return v
    return 1


def _make_l1_kernel(tm, rows, n_blocks, steps, need_guard, need_mask):
    """Grid = (n_par, steps); out_ref is a resident (1, 8, 128) f32 accumulator per core-slice."""
    n_chunks = tm // _CHUNK

    def kernel(pred_ref, targ_ref, out_ref):
        c = pl.program_id(0)
        i = pl.program_id(1)

        @pl.when(i == 0)
        def _():
            out_ref[...] = jnp.zeros_like(out_ref)

        blk = c * steps + i

        def accumulate():
            def body(j, acc):
                r = pl.multiple_of(j * _CHUNK, _CHUNK)
                p = pred_ref[pl.ds(r, _CHUNK), :].astype(jnp.float32)
                t = targ_ref[pl.ds(r, _CHUNK), :].astype(jnp.float32)
                d = jnp.abs(p - t)                                   # (_CHUNK, 128)
                if need_mask:
                    # Mask rows past the valid global extent (edge / clamped block).
                    local = lax.broadcasted_iota(jnp.int32, (_CHUNK, 1), 0)
                    d = jnp.where(blk * tm + r + local < rows, d, 0.0)
                # Fold sublane groups into the (8,128) partial: pure VPU adds.
                return acc + d.reshape(_CHUNK // _SUB, _SUB, _LANE).sum(axis=0)

            acc = lax.fori_loop(0, n_chunks, body,
                                jnp.zeros((_SUB, _LANE), jnp.float32), unroll=True)
            out_ref[...] += acc.reshape(1, _SUB, _LANE)

        if need_guard:
            pl.when(blk < n_blocks)(accumulate)
        else:
            accumulate()

    return kernel


def _l1_main_slab_sum(flat_p, flat_t, rows, tm, n_blocks, n_par, core_parallel):
    steps = _cdiv(n_blocks, n_par)
    need_guard = steps * n_par != n_blocks          # some (c, i) map past the last block
    need_mask = n_blocks * tm != rows               # last block only partially valid

    # Zero-copy prefix slice + reshape of the flat inputs into a (rows, 128) slab.
    p2 = flat_p[: rows * _LANE].reshape(rows, _LANE)
    t2 = flat_t[: rows * _LANE].reshape(rows, _LANE)

    if need_guard:
        def idx(c, i):
            return (jnp.minimum(c * steps + i, n_blocks - 1), 0)
    else:
        def idx(c, i):
            return (c * steps + i, 0)

    kernel = _make_l1_kernel(tm, rows, n_blocks, steps, need_guard, need_mask)

    n_main = rows * _LANE
    bytes_accessed = n_main * (jnp.dtype(flat_p.dtype).itemsize
                               + jnp.dtype(flat_t.dtype).itemsize)
    cost = pl.CostEstimate(flops=3 * n_main, transcendentals=0,
                           bytes_accessed=int(bytes_accessed))

    if core_parallel:
        dim_sem = (pltpu.CORE_PARALLEL, pltpu.ARBITRARY)
    else:
        dim_sem = ("parallel", "arbitrary")

    partials = pl.pallas_call(
        kernel,
        out_shape=jax.ShapeDtypeStruct((n_par, _SUB, _LANE), jnp.float32),
        grid_spec=pltpu.PrefetchScalarGridSpec(
            num_scalar_prefetch=0,
            grid=(n_par, steps),
            in_specs=[
                pl.BlockSpec((tm, _LANE), idx),
                pl.BlockSpec((tm, _LANE), idx),
            ],
            out_specs=pl.BlockSpec((1, _SUB, _LANE), lambda c, i: (c, 0, 0)),
        ),
        compiler_params=pltpu.CompilerParams(
            dimension_semantics=dim_sem,
            vmem_limit_bytes=32 * 1024 * 1024),
        cost_estimate=cost,
    )(p2, t2)
    return jnp.sum(partials)


def l1_loss(pred, target, weight=None, *, loss_weight=1.0, reduction='mean'):
    assert pred.shape == target.shape
    # TODO(synk): element-wise `weight` and reduction='none' paths not implemented.
    assert weight is None
    assert reduction in ('mean', 'sum')

    n_elem = pred.size
    flat_p = pred.reshape(-1)       # native dtype, no pad / no upcast copies
    flat_t = target.reshape(-1)

    sub = max(_packed_sublanes(pred.dtype), _packed_sublanes(target.dtype))
    max_itemsize = max(jnp.dtype(pred.dtype).itemsize, jnp.dtype(target.dtype).itemsize)

    rows_all = n_elem // _LANE
    rows = (rows_all // sub) * sub                   # kernel-handled, sublane-aligned rows

    cores = _num_tensorcores()

    total = jnp.float32(0.0)
    if rows > 0:
        # ~2 MiB per input block (4096 rows f32 / 8192 rows bf16), multiple of _CHUNK.
        tm_max = max(_CHUNK, (_TARGET_BLOCK_BYTES // (_LANE * max_itemsize)) // _CHUNK * _CHUNK)
        tm = min(tm_max, _round_up(rows, _CHUNK))
        n_blocks = _cdiv(rows, tm)
        n_par = cores if (cores > 1 and n_blocks >= cores) else 1
        if n_par > 1:
            try:
                total = total + _l1_main_slab_sum(flat_p, flat_t, rows, tm, n_blocks,
                                                  n_par, core_parallel=True)
            except Exception:
                # Fall back to the single-core configuration if CORE_PARALLEL lowering
                # is unavailable on this chip/toolchain.
                total = total + _l1_main_slab_sum(flat_p, flat_t, rows, tm, n_blocks,
                                                  1, core_parallel=False)
        else:
            total = total + _l1_main_slab_sum(flat_p, flat_t, rows, tm, n_blocks,
                                              1, core_parallel=False)

    n_main = rows * _LANE
    if n_main < n_elem:
        # Sub-sublane + sub-lane remainder: at most (sub-1)*128 + 127 elements.
        total = total + jnp.sum(
            jnp.abs(flat_p[n_main:].astype(jnp.float32)
                    - flat_t[n_main:].astype(jnp.float32)))

    if reduction == 'mean':
        total = total / jnp.float32(n_elem)
    out = jnp.float32(loss_weight) * total
    # Match PyTorch L1Loss: result carries the inputs' (promoted) dtype.
    return out.astype(jnp.result_type(pred.dtype, target.dtype))


if __name__ == "__main__":
    key = jax.random.PRNGKey(0)
    k1, k2, k3, k4 = jax.random.split(key, 4)

    # Primary check: (N, C, H, W) = (2, 4, 16, 16), f32, reduction='mean'.
    N, C, H, W = 2, 4, 16, 16
    pred = jax.random.uniform(k1, (N, C, H, W), jnp.float32)
    target = jax.random.uniform(k2, (N, C, H, W), jnp.float32)
    out = jax.block_until_ready(l1_loss(pred, target, loss_weight=1.0, reduction='mean'))
    ref = jnp.mean(jnp.abs(pred - target))
    assert jnp.allclose(out, ref, rtol=1e-5, atol=1e-6), (out, ref)

    # Secondary check: odd sizes (exercises masked last block + tiny JAX tail),
    # bf16 inputs streamed at native width, loss_weight != 1, reduction='sum'.
    p2 = jax.random.uniform(k3, (1, 3, 50, 37), jnp.float32).astype(jnp.bfloat16)
    t2 = jax.random.uniform(k4, (1, 3, 50, 37), jnp.float32).astype(jnp.bfloat16)
    out2 = jax.block_until_ready(l1_loss(p2, t2, loss_weight=0.5, reduction='sum'))
    ref2 = 0.5 * jnp.sum(jnp.abs(p2.astype(jnp.float32) - t2.astype(jnp.float32)))
    assert jnp.allclose(out2.astype(jnp.float32), ref2, rtol=2e-2, atol=1.0), (out2, ref2)

    print("KERNEL_OK")
</pallas_src>

<mosaic_0001>
module attributes {stable_mosaic.version = 11 : i64} {
  func.func @kernel(%arg0: i32, %arg1: i32, %arg2: memref<256x128xf32, #tpu.memory_space<vmem>>, %arg3: memref<256x128xf32, #tpu.memory_space<vmem>>, %arg4: memref<1x8x128xf32, #tpu.memory_space<vmem>>) attributes {dimension_semantics = [#tpu.dimension_semantics<parallel>, #tpu.dimension_semantics<arbitrary>], iteration_bounds = array<i64: 1, 1>, scalar_prefetch = 0 : i64, scratch_operands = 0 : i64, tpu.core_type = #tpu.core_type<tc>, window_params = [{transform_indices = @transform_0, window_bounds = array<i64: 256, 128>}, {transform_indices = @transform_1, window_bounds = array<i64: 256, 128>}, {transform_indices = @transform_2, window_bounds = array<i64: 1, 8, 128>}]} {
    %c0_i32 = arith.constant 0 : i32
    %0 = arith.cmpi eq, %arg1, %c0_i32 : i32
    %1 = arith.extui %0 : i1 to i32
    %c0_i32_0 = arith.constant 0 : i32
    %2 = arith.cmpi ne, %1, %c0_i32_0 : i32
    scf.if %2 {
      %cst_13 = arith.constant 0.000000e+00 : f32
      %32 = vector.broadcast %cst_13 : f32 to vector<1x8x128xf32>
      %c0_14 = arith.constant 0 : index
      %c0_15 = arith.constant 0 : index
      %c0_16 = arith.constant 0 : index
      %33 = vector.load %arg4[%c0_14, %c0_15, %c0_16] : memref<1x8x128xf32, #tpu.memory_space<vmem>>, vector<1x8x128xf32>
      tpu.vector_store %arg4[%c0_14, %c0_15, %c0_16], %32 {strides = array<i32>} : memref<1x8x128xf32, #tpu.memory_space<vmem>>, vector<1x8x128xf32>,
    } else {
    }
    %c1_i32 = arith.constant 1 : i32
    %3 = arith.muli %arg0, %c1_i32 : i32
    %4 = arith.addi %3, %arg1 : i32
    %cst = arith.constant 0.000000e+00 : f32
    %5 = vector.broadcast %cst : f32 to vector<8x128xf32>
    %c0_i32_1 = arith.constant 0 : i32
    %c256_i32 = arith.constant 256 : i32
    %6 = arith.muli %c0_i32_1, %c256_i32 : i32
    %7 = tpu.assume_multiple %6, 256 : i32
    %8 = arith.index_cast %7 : i32 to index
    %c0 = arith.constant 0 : index
    %9 = vector.load %arg2[%8, %c0] : memref<256x128xf32, #tpu.memory_space<vmem>>, vector<256x128xf32>
    %10 = arith.index_cast %7 : i32 to index
    %c0_2 = arith.constant 0 : index
    %11 = vector.load %arg3[%10, %c0_2] : memref<256x128xf32, #tpu.memory_space<vmem>>, vector<256x128xf32>
    %12 = arith.subf %9, %11 : vector<256x128xf32>
    %13 = math.absf %12 : vector<256x128xf32>
    %14 = tpu.iota {dimensions = array<i32: 0>} : vector<256x1xi32>
    %c256_i32_3 = arith.constant 256 : i32
    %15 = arith.muli %4, %c256_i32_3 : i32
    %16 = arith.addi %15, %7 : i32
    %17 = vector.broadcast %16 : i32 to vector<256x1xi32>
    %18 = arith.addi %17, %14 : vector<256x1xi32>
    %c16_i32 = arith.constant 16 : i32
    %19 = vector.broadcast %c16_i32 : i32 to vector<256x1xi32>
    %20 = arith.cmpi slt, %18, %19 : vector<256x1xi32>
    %cst_4 = arith.constant 0.000000e+00 : f32
    %21 = vector.shape_cast %20 : vector<256x1xi1> to vector<256x1xi1>
    %22 = vector.broadcast %21 : vector<256x1xi1> to vector<256x128xi1>
    %23 = vector.broadcast %cst_4 : f32 to vector<256x128xf32>
    %24 = arith.select %22, %13, %23 : vector<256x128xi1>, vector<256x128xf32>
    %25 = vector.shape_cast %24 : vector<256x128xf32> to vector<32x8x128xf32>
    %cst_5 = arith.constant dense<0.000000e+00> : vector<8x128xf32>
    %26 = vector.multi_reduction <add>, %25, %cst_5 [0] : vector<32x8x128xf32> to vector<8x128xf32>
    %27 = arith.addf %5, %26 : vector<8x128xf32>
    %c1_i32_6 = arith.constant 1 : i32
    %c0_7 = arith.constant 0 : index
    %c0_8 = arith.constant 0 : index
    %c0_9 = arith.constant 0 : index
    %28 = vector.load %arg4[%c0_7, %c0_8, %c0_9] : memref<1x8x128xf32, #tpu.memory_space<vmem>>, vector<1x8x128xf32>
    %29 = vector.shape_cast %27 : vector<8x128xf32> to vector<1x8x128xf32>
    %30 = arith.addf %28, %29 : vector<1x8x128xf32>
    %c0_10 = arith.constant 0 : index
    %c0_11 = arith.constant 0 : index
    %c0_12 = arith.constant 0 : index
    %31 = vector.load %arg4[%c0_10, %c0_11, %c0_12] : memref<1x8x128xf32, #tpu.memory_space<vmem>>, vector<1x8x128xf32>
    tpu.vector_store %arg4[%c0_10, %c0_11, %c0_12], %30 {strides = array<i32>} : memref<1x8x128xf32, #tpu.memory_space<vmem>>, vector<1x8x128xf32>,
    return
  }
  func.func @transform_0(%arg0: i32, %arg1: i32) -> (i32, i32) {
    %c1_i32 = arith.constant 1 : i32
    %0 = arith.muli %arg0, %c1_i32 : i32
    %1 = arith.addi %0, %arg1 : i32
    %c0_i32 = arith.constant 0 : i32
    %c0_i32_0 = arith.constant 0 : i32
    return %1, %c0_i32 : i32, i32
  }
  func.func @transform_1(%arg0: i32, %arg1: i32) -> (i32, i32) {
    %c1_i32 = arith.constant 1 : i32
    %0 = arith.muli %arg0, %c1_i32 : i32
    %1 = arith.addi %0, %arg1 : i32
    %c0_i32 = arith.constant 0 : i32
    %c0_i32_0 = arith.constant 0 : i32
    return %1, %c0_i32 : i32, i32
  }
  func.func @transform_2(%arg0: i32, %arg1: i32) -> (i32, i32, i32) {
    %c0_i32 = arith.constant 0 : i32
    %c0_i32_0 = arith.constant 0 : i32
    %c0_i32_1 = arith.constant 0 : i32
    return %arg0, %c0_i32, %c0_i32_0 : i32, i32, i32
  }
}

</mosaic_0001>

<bundles_post_ra>
// kernel: tpu_custom_call.1
= control target key start
LH: loop header
LB: loop body
LE: loop exit
PB: predicated region body
PF: predicated region fallthrough
CT: control target
= control target key end

     0   :  { %7 = vsyncpa [#allocation3], 0  ;;  %s579_s0 = inlined_call_operand.hbm [shape: f32[16,128], index: 0, kind: input, shape index: {}]   ;;  %s580_s1 = inlined_call_operand.hbm [shape: f32[16,128], index: 1, kind: input, shape index: {}]   ;;  %s581_s2 = inlined_call_operand.hbm [shape: f32[1,8,128], index: 2, kind: output, shape index: {}]  }
   0x1   :  { %8 = vsyncpa [#allocation6], 0 }
   0x2   :  { %9 = vsyncpa [#allocation4], 0 }
   0x3   :  { %18 = vsyncadd [#allocation3], 3840  ;;  %s523_s9 = smov [#allocation2]   ;;  %s451_s13 = scalar_lea.hbm %s579_s0, 256 }
   0x4   :  { %s23_s10 = sshll.u32 %s523_s9, 4  ;;  %p452_p0 = scmp.ne.s32.totalorder %s579_s0, %s451_s13  ;;  %s24_s10 = int_to_ptr.vmem [resolvable:$true] %s23_s10 }
   0x5   :  { %p455_p1 = scmp.lt.u32.totalorder %s451_s13, %s579_s0 }
   0x7   :  { %p457_p2 = pnand %p455_p1, %p452_p0 }
   0x9   :  { %460 = shalt.err (!%p457_p2)
}
   0xa   :  { %s461_s18 = scalar_lea.vmem %s24_s10, 256  ;;  %s465_s19 = scalar_lea.vmem %s24_s10, 4096 }
   0xb   :  { %p462_p3 = scmp.ne.s32.totalorder %s24_s10, %s461_s18  ;;  %p466_p4 = scmp.lt.s32.totalorder %s24_s10, %s24_s10 }
   0xc   :  { %p467_p5 = scmp.lt.s32.totalorder %s465_s19, %s461_s18 }
   0xe   :  { %p468_p6 = por %p467_p5, %p466_p4 }
  0x10   :  { %p469_p7 = pnand %p468_p6, %p462_p3 }
  0x12   :  { %472 = shalt.err (!%p469_p7)
}
  0x13   :  { %s524_s20 = smov 128   ;;  %s525_s21 = smov 8  }
  0x14   :  { %29 = dma.hbm_to_vmem [thread:$0]  %s579_s0, 256, %s24_s10, [#allocation3], %s524_s20, %s524_s20, %s525_s21  }
  0x15   :  { %38 = vsyncadd [#allocation6], 3840  ;;  %s526_s24 = smov [#allocation5]   ;;  %s473_s28 = scalar_lea.hbm %s580_s1, 256 }
  0x16   :  { %s43_s25 = sshll.u32 %s526_s24, 4  ;;  %p474_p8 = scmp.ne.s32.totalorder %s580_s1, %s473_s28  ;;  %s44_s25 = int_to_ptr.vmem [resolvable:$true] %s43_s25 }
  0x17   :  { %p477_p9 = scmp.lt.u32.totalorder %s473_s28, %s580_s1 }
  0x19   :  { %p479_p10 = pnand %p477_p9, %p474_p8 }
  0x1b   :  { %482 = shalt.err (!%p479_p10)
}
  0x1c   :  { %s483_s5 = scalar_lea.vmem %s44_s25, 256  ;;  %s487_s0 = scalar_lea.vmem %s44_s25, 4096 }
  0x1d   :  { %p484_p11 = scmp.ne.s32.totalorder %s44_s25, %s483_s5  ;;  %p488_p12 = scmp.lt.s32.totalorder %s44_s25, %s44_s25 }
  0x1e   :  { %p489_p13 = scmp.lt.s32.totalorder %s487_s0, %s483_s5 }
  0x20   :  { %p490_p0 = por %p489_p13, %p488_p12 }
  0x22   :  { %p491_p1 = pnand %p490_p0, %p484_p11 }
  0x24   :  { %494 = shalt.err (!%p491_p1)
}
  0x25   :  { %49 = dma.hbm_to_vmem [thread:$0]  %s580_s1, 256, %s44_s25, [#allocation6], %s524_s20, %s524_s20, %s525_s21  }
  0x26   :  { %517 = dma.done.wait [#allocation3], 4096  }
  0x27   :  { %518 = vsyncadd [#allocation3], 4294963200 }
  0x28   :  { %519 = dma.done.wait [#allocation6], 4096  }
  0x29   :  { %520 = vsyncadd [#allocation6], 4294963200  ;;  %v70_v0 = vld [vmem:[#allocation2] sm:$0xff]  ;;  %v71_v1 = vld [vmem:[#allocation2 + $0x8] sm:$0xff]  ;;  %s527_s8 = smov [#allocation7]  }
  0x2a   :  { %v102_v2 = vld [vmem:[#allocation5] sm:$0xff]  ;;  %v103_v3 = vld [vmem:[#allocation5 + $0x8] sm:$0xff]  ;;  %s435_s9 = sshll.u32 %s527_s8, 4  ;;  %s436_s9 = int_to_ptr.vmem [resolvable:$true] %s435_s9 }
  0x2b   :  { %v134_v4 = vsub.f32 %v70_v0, %v102_v2  ;;  %v135_v5 = vsub.f32 %v71_v1, %v103_v3  ;;  %s495_s10 = scalar_lea.vmem %s436_s9, 128  ;;  %p500_p3 = scmp.lt.s32.totalorder %s436_s9, %s436_s9 }
  0x2c   :  { %p496_p2 = scmp.ne.s32.totalorder %s436_s9, %s495_s10  ;;  %p501_p4 = scmp.lt.s32.totalorder %s495_s10, %s495_s10 }
  0x2d   :  { %v166_v6 = vand.u32 2147483647, %v134_v4  ;;  %v167_v7 = vand.u32 2147483647, %v135_v5 }
  0x2e   :  { %p502_p5 = por %p501_p4, %p500_p3 }
  0x2f   :  { %v394_v8 = vadd.f32 %v167_v7, %v166_v6 }
  0x30   :  { %p503_p6 = pnand %p502_p5, %p496_p2 }
  0x31   :  { %428 = vst [vmem:[#allocation7] sm:$0xff] %v394_v8 }
  0x32   :  { %506 = shalt.err (!%p503_p6)
}
  0x33   :  { %s507_s12 = scalar_lea.hbm %s581_s2, 128 }
  0x34   :  { %p508_p7 = scmp.ne.s32.totalorder %s581_s2, %s507_s12  ;;  %p511_p8 = scmp.lt.u32.totalorder %s507_s12, %s581_s2 }
  0x36   :  { %p513_p9 = pnand %p511_p8, %p508_p7 }
  0x38   :  { %516 = shalt.err (!%p513_p9)
}
  0x39   :  { %438 = dma.vmem_to_hbm [thread:$0]  %s436_s9, 128, %s581_s2, [#allocation4]  }
  0x3a   :  { %521 = dma.done.wait [#allocation4], 128  }
  0x3b   :  { %522 = vsyncadd [#allocation4], 4294967168 }
  0x3c   :  { %442 = vsyncpa [#allocation3], 1 }
  0x3d   :  { %443 = vsyncpa [#allocation6], 1 }
  0x3e   :  { %444 = vsyncpa [#allocation4], 1 }

</bundles_post_ra>
